<compile_context>
chip_gen: v6e
topology: v6e:2x2x1
jax: 0.10.0
libtpu: 0.0.40
codegen_flags: <defaults>
</compile_context>

<pallas_src>
import math
from functools import partial

import jax
import jax.numpy as jnp
from jax import lax
from jax.experimental import pallas as pl
from jax.experimental.pallas import tpu as pltpu

EPS = 1e-8


def _complex_conv_kernel(pr_ref, pi_ref, w_ref, mb_ref, pb_ref, m_ref, phi_ref,
                         *, batch_block, M):
    """One grid step = `batch_block` batch elements.

    pr_ref / pi_ref : (batch_block, C_in*K*K, M)  im2col patches of x.real / x.imag
    w_ref           : (C_out, C_in*K*K)           flattened conv weight
    mb_ref / pb_ref : (C_out, 1)                  magnitude / phase bias
    m_ref / phi_ref : (batch_block, C_out, M)     outputs (NCHW with flattened HW)
    """
    w = w_ref[...]            # (C_out, KKC)
    mb = mb_ref[...]          # (C_out, 1) -> broadcasts over (C_out, M)
    pb = pb_ref[...]

    for j in range(batch_block):                      # static, unrolled
        pr = pr_ref[j]                                # (KKC, M)
        pi = pi_ref[j]
        # |x| patches computed in-kernel (padding zeros stay zero) -> no 3rd DMA stream.
        pa = jnp.sqrt(pr * pr + pi * pi)

        # Fuse the three convs into a single MXU matmul: RHS = [pr | pi | pa]
        # along the lane axis (each chunk is a multiple of 128 lanes -> aligned).
        p_all = jnp.concatenate([pr, pi, pa], axis=-1)            # (KKC, 3*M)
        acc = jnp.dot(w, p_all, preferred_element_type=jnp.float32)  # (C_out, 3*M)

        psi_r = acc[:, :M]
        psi_i = acc[:, M:2 * M]
        chi = acc[:, 2 * M:]

        m_psi = jnp.sqrt(psi_r * psi_r + psi_i * psi_i) + mb
        chi = chi + mb

        # get_stable_angle: clamp tiny imaginary parts to +eps before angle().
        psi_i_s = jnp.where((psi_i < EPS) & (psi_i > -EPS), EPS, psi_i)
        phi = jnp.arctan2(psi_i_s, psi_r) + pb

        m_ref[j] = 0.5 * m_psi + 0.5 * chi            # lane-dense (C_out, M) store
        phi_ref[j] = phi


def complex_conv2d_pallas(x_real, x_imag, weight_oihw, magnitude_bias, phase_bias,
                          *, batch_block=1):
    """x_real/x_imag: (B, C_in, H, W) float32 (NCHW, the torch module's complex input
    split into planes). weight_oihw: (C_out, C_in, K, K); biases: (1, C_out, 1, 1).
    Returns (m, phi), each (B, C_out, H, W) float32.

    batch_block: batch elements per grid step. Keep >=2 grid steps on v7x
    (2 TensorCores); raise (e.g. 8-16) on single-TC v5e/v6e for large B.
    """
    B, C_in, H, W = x_real.shape
    C_out, _, K, _ = weight_oihw.shape
    assert K % 2 == 1, "only odd kernel sizes (TF-SAME symmetric pad) supported"
    assert B % batch_block == 0
    pad = (K - 1) // 2
    M = H * W
    KKC = C_in * K * K

    # --- wrapper glue: im2col (channels*taps on sublane axis, spatial on lanes) ---
    def im2col(v):  # (B, C_in, H, W) -> (B, C_in*K*K, H*W)
        vp = jnp.pad(v, ((0, 0), (0, 0), (pad, pad), (pad, pad)))
        taps = [vp[:, :, dy:dy + H, dx:dx + W] for dy in range(K) for dx in range(K)]
        p = jnp.stack(taps, axis=2)                   # (B, C_in, K*K, H, W)
        return p.reshape(B, KKC, M)

    pr = im2col(x_real)
    pi = im2col(x_imag)

    w_flat = weight_oihw.reshape(C_out, KKC)          # matches patch order (c, dy, dx)
    mb = magnitude_bias.reshape(C_out, 1)
    pb = phase_bias.reshape(C_out, 1)

    kernel = partial(_complex_conv_kernel, batch_block=batch_block, M=M)

    in_spec_p = pl.BlockSpec((batch_block, KKC, M), lambda b: (b, 0, 0))
    out_spec = pl.BlockSpec((batch_block, C_out, M), lambda b: (b, 0, 0))

    m, phi = pl.pallas_call(
        kernel,
        out_shape=(jax.ShapeDtypeStruct((B, C_out, M), jnp.float32),
                   jax.ShapeDtypeStruct((B, C_out, M), jnp.float32)),
        grid_spec=pltpu.PrefetchScalarGridSpec(
            num_scalar_prefetch=0,
            grid=(B // batch_block,),
            in_specs=[
                in_spec_p, in_spec_p,
                # grid-invariant constants (~1.3 KB): no double-buffering needed
                pl.BlockSpec((C_out, KKC), lambda b: (0, 0)),
                pl.BlockSpec((C_out, 1), lambda b: (0, 0)),
                pl.BlockSpec((C_out, 1), lambda b: (0, 0)),
            ],
            out_specs=[out_spec, out_spec],
        ),
        compiler_params=pltpu.CompilerParams(
            dimension_semantics=("parallel",)),
    )(pr, pi, w_flat, mb, pb)

    # Outputs are already NCHW (channels on sublanes, spatial on lanes).
    return m.reshape(B, C_out, H, W), phi.reshape(B, C_out, H, W)


def reference_forward(x_real, x_imag, weight_oihw, magnitude_bias, phase_bias):
    """Plain-JAX reference mirroring apply_layer / ComplexConv2d.forward (NCHW)."""
    K = weight_oihw.shape[-1]
    p = (K - 1) // 2
    conv = lambda v: lax.conv_general_dilated(
        v, weight_oihw, window_strides=(1, 1), padding=((p, p), (p, p)),
        dimension_numbers=('NCHW', 'OIHW', 'NCHW'))
    psi_r = conv(x_real)
    psi_i = conv(x_imag)
    chi = conv(jnp.sqrt(x_real ** 2 + x_imag ** 2))
    m_psi = jnp.sqrt(psi_r ** 2 + psi_i ** 2)
    psi_i_s = jnp.where((psi_i < EPS) & (psi_i > -EPS), EPS, psi_i)
    phi = jnp.arctan2(psi_i_s, psi_r)
    m_psi = m_psi + magnitude_bias
    chi = chi + magnitude_bias
    phi = phi + phase_bias
    return 0.5 * m_psi + 0.5 * chi, phi


if __name__ == "__main__":
    B, C_in, C_out, H, W, K = 2, 4, 8, 16, 16, 3

    key = jax.random.PRNGKey(0)
    k_xr, k_xi, k_w, k_mb = jax.random.split(key, 4)

    # Complex input x = x_real + 1j * x_imag  (NCHW).
    x_real = jax.random.normal(k_xr, (B, C_in, H, W), jnp.float32)
    x_imag = jax.random.normal(k_xi, (B, C_in, H, W), jnp.float32)

    # Deterministic parameter init (shapes from the module's __init__).
    fan_in = C_in * K * K
    w_bound = 1.0 / math.sqrt(fan_in)
    weight = jax.random.uniform(k_w, (C_out, C_in, K, K), jnp.float32,
                                minval=-w_bound, maxval=w_bound)
    magnitude_bias = jax.random.uniform(k_mb, (1, C_out, 1, 1), jnp.float32,
                                        minval=-w_bound, maxval=w_bound)
    phase_bias = jnp.zeros((1, C_out, 1, 1), jnp.float32)

    m, phi = complex_conv2d_pallas(x_real, x_imag, weight, magnitude_bias, phase_bias)
    jax.block_until_ready((m, phi))

    m_ref, phi_ref = reference_forward(x_real, x_imag, weight, magnitude_bias, phase_bias)
    assert m.shape == (B, C_out, H, W) and phi.shape == (B, C_out, H, W)
    assert jnp.allclose(m, m_ref, rtol=1e-3, atol=1e-3), "magnitude mismatch"
    assert jnp.allclose(phi, phi_ref, rtol=1e-3, atol=1e-3), "phase mismatch"

    print("KERNEL_OK")
</pallas_src>

<mosaic_0001>
module attributes {stable_mosaic.version = 11 : i64} {
  func.func @_complex_conv_kernel(%arg0: i32, %arg1: memref<1x36x256xf32, #tpu.memory_space<vmem>>, %arg2: memref<1x36x256xf32, #tpu.memory_space<vmem>>, %arg3: memref<8x36xf32, #tpu.memory_space<vmem>>, %arg4: memref<8x1xf32, #tpu.memory_space<vmem>>, %arg5: memref<8x1xf32, #tpu.memory_space<vmem>>, %arg6: memref<1x8x256xf32, #tpu.memory_space<vmem>>, %arg7: memref<1x8x256xf32, #tpu.memory_space<vmem>>) attributes {dimension_semantics = [#tpu.dimension_semantics<parallel>], iteration_bounds = array<i64: 2>, scalar_prefetch = 0 : i64, scratch_operands = 0 : i64, tpu.core_type = #tpu.core_type<tc>, window_params = [{transform_indices = @transform_0, window_bounds = array<i64: 1, 36, 256>}, {transform_indices = @transform_1, window_bounds = array<i64: 1, 36, 256>}, {pipeline_mode = #tpu.pipeline_mode<synchronous>, transform_indices = @transform_2, window_bounds = array<i64: 8, 36>}, {pipeline_mode = #tpu.pipeline_mode<synchronous>, transform_indices = @transform_3, window_bounds = array<i64: 8, 1>}, {pipeline_mode = #tpu.pipeline_mode<synchronous>, transform_indices = @transform_4, window_bounds = array<i64: 8, 1>}, {transform_indices = @transform_5, window_bounds = array<i64: 1, 8, 256>}, {transform_indices = @transform_6, window_bounds = array<i64: 1, 8, 256>}]} {
    %c0 = arith.constant 0 : index
    %c0_0 = arith.constant 0 : index
    %0 = vector.load %arg3[%c0, %c0_0] : memref<8x36xf32, #tpu.memory_space<vmem>>, vector<8x36xf32>
    %c0_1 = arith.constant 0 : index
    %c0_2 = arith.constant 0 : index
    %1 = vector.load %arg4[%c0_1, %c0_2] : memref<8x1xf32, #tpu.memory_space<vmem>>, vector<8x1xf32>
    %c0_3 = arith.constant 0 : index
    %c0_4 = arith.constant 0 : index
    %2 = vector.load %arg5[%c0_3, %c0_4] : memref<8x1xf32, #tpu.memory_space<vmem>>, vector<8x1xf32>
    %c0_5 = arith.constant 0 : index
    %c0_6 = arith.constant 0 : index
    %c0_7 = arith.constant 0 : index
    %3 = vector.load %arg1[%c0_5, %c0_6, %c0_7] : memref<1x36x256xf32, #tpu.memory_space<vmem>>, vector<1x36x256xf32>
    %4 = vector.shape_cast %3 : vector<1x36x256xf32> to vector<36x256xf32>
    %c0_8 = arith.constant 0 : index
    %c0_9 = arith.constant 0 : index
    %c0_10 = arith.constant 0 : index
    %5 = vector.load %arg2[%c0_8, %c0_9, %c0_10] : memref<1x36x256xf32, #tpu.memory_space<vmem>>, vector<1x36x256xf32>
    %6 = vector.shape_cast %5 : vector<1x36x256xf32> to vector<36x256xf32>
    %7 = arith.mulf %4, %4 : vector<36x256xf32>
    %8 = arith.mulf %6, %6 : vector<36x256xf32>
    %9 = arith.addf %7, %8 : vector<36x256xf32>
    %10 = math.sqrt %9 : vector<36x256xf32>
    %11 = tpu.concatenate %4, %6, %10 in 1 : vector<36x256xf32>, vector<36x256xf32>, vector<36x256xf32> -> vector<36x768xf32>
    %cst = arith.constant dense<0.000000e+00> : vector<8x768xf32>
    %12 = tpu.matmul %0, %11, %cst {dimension_numbers = #tpu.dot_dimension_numbers<[1], [0], [0], [1], [0, 0, 1, 1], [], []>} : vector<8x36xf32>, vector<36x768xf32>, vector<8x768xf32> -> vector<8x768xf32>
    %13 = vector.extract_strided_slice %12 {offsets = [0, 0], sizes = [8, 256], strides = [1, 1]} : vector<8x768xf32> to vector<8x256xf32>
    %14 = vector.extract_strided_slice %12 {offsets = [0, 256], sizes = [8, 256], strides = [1, 1]} : vector<8x768xf32> to vector<8x256xf32>
    %15 = vector.extract_strided_slice %12 {offsets = [0, 512], sizes = [8, 256], strides = [1, 1]} : vector<8x768xf32> to vector<8x256xf32>
    %16 = arith.mulf %13, %13 : vector<8x256xf32>
    %17 = arith.mulf %14, %14 : vector<8x256xf32>
    %18 = arith.addf %16, %17 : vector<8x256xf32>
    %19 = math.sqrt %18 : vector<8x256xf32>
    %20 = vector.broadcast %1 : vector<8x1xf32> to vector<8x256xf32>
    %21 = arith.addf %19, %20 : vector<8x256xf32>
    %22 = vector.broadcast %1 : vector<8x1xf32> to vector<8x256xf32>
    %23 = arith.addf %15, %22 : vector<8x256xf32>
    %cst_11 = arith.constant 9.99999993E-9 : f32
    %24 = vector.broadcast %cst_11 : f32 to vector<8x256xf32>
    %25 = arith.cmpf olt, %14, %24 : vector<8x256xf32>
    %cst_12 = arith.constant -9.99999993E-9 : f32
    %26 = vector.broadcast %cst_12 : f32 to vector<8x256xf32>
    %27 = arith.cmpf ogt, %14, %26 : vector<8x256xf32>
    %28 = arith.andi %25, %27 : vector<8x256xi1>
    %cst_13 = arith.constant 9.99999993E-9 : f32
    %29 = vector.broadcast %cst_13 : f32 to vector<8x256xf32>
    %30 = arith.select %28, %29, %14 : vector<8x256xi1>, vector<8x256xf32>
    %31 = math.atan2 %30, %13 : vector<8x256xf32>
    %32 = vector.broadcast %2 : vector<8x1xf32> to vector<8x256xf32>
    %33 = arith.addf %31, %32 : vector<8x256xf32>
    %cst_14 = arith.constant 5.000000e-01 : f32
    %34 = vector.broadcast %cst_14 : f32 to vector<8x256xf32>
    %35 = arith.mulf %34, %21 : vector<8x256xf32>
    %cst_15 = arith.constant 5.000000e-01 : f32
    %36 = vector.broadcast %cst_15 : f32 to vector<8x256xf32>
    %37 = arith.mulf %36, %23 : vector<8x256xf32>
    %38 = arith.addf %35, %37 : vector<8x256xf32>
    %c0_16 = arith.constant 0 : index
    %c0_17 = arith.constant 0 : index
    %c0_18 = arith.constant 0 : index
    %39 = vector.load %arg6[%c0_16, %c0_17, %c0_18] : memref<1x8x256xf32, #tpu.memory_space<vmem>>, vector<1x8x256xf32>
    %40 = vector.shape_cast %39 : vector<1x8x256xf32> to vector<8x256xf32>
    %41 = vector.shape_cast %38 : vector<8x256xf32> to vector<1x8x256xf32>
    tpu.vector_store %arg6[%c0_16, %c0_17, %c0_18], %41 {strides = array<i32>} : memref<1x8x256xf32, #tpu.memory_space<vmem>>, vector<1x8x256xf32>,
    %c0_19 = arith.constant 0 : index
    %c0_20 = arith.constant 0 : index
    %c0_21 = arith.constant 0 : index
    %42 = vector.load %arg7[%c0_19, %c0_20, %c0_21] : memref<1x8x256xf32, #tpu.memory_space<vmem>>, vector<1x8x256xf32>
    %43 = vector.shape_cast %42 : vector<1x8x256xf32> to vector<8x256xf32>
    %44 = vector.shape_cast %33 : vector<8x256xf32> to vector<1x8x256xf32>
    tpu.vector_store %arg7[%c0_19, %c0_20, %c0_21], %44 {strides = array<i32>} : memref<1x8x256xf32, #tpu.memory_space<vmem>>, vector<1x8x256xf32>,
    return
  }
  func.func @transform_0(%arg0: i32) -> (i32, i32, i32) {
    %c0_i32 = arith.constant 0 : i32
    %c0_i32_0 = arith.constant 0 : i32
    %c0_i32_1 = arith.constant 0 : i32
    return %arg0, %c0_i32, %c0_i32_0 : i32, i32, i32
  }
  func.func @transform_1(%arg0: i32) -> (i32, i32, i32) {
    %c0_i32 = arith.constant 0 : i32
    %c0_i32_0 = arith.constant 0 : i32
    %c0_i32_1 = arith.constant 0 : i32
    return %arg0, %c0_i32, %c0_i32_0 : i32, i32, i32
  }
  func.func @transform_2(%arg0: i32) -> (i32, i32) {
    %c0_i32 = arith.constant 0 : i32
    %c0_i32_0 = arith.constant 0 : i32
    %c0_i32_1 = arith.constant 0 : i32
    return %c0_i32, %c0_i32_0 : i32, i32
  }
  func.func @transform_3(%arg0: i32) -> (i32, i32) {
    %c0_i32 = arith.constant 0 : i32
    %c0_i32_0 = arith.constant 0 : i32
    %c0_i32_1 = arith.constant 0 : i32
    return %c0_i32, %c0_i32_0 : i32, i32
  }
  func.func @transform_4(%arg0: i32) -> (i32, i32) {
    %c0_i32 = arith.constant 0 : i32
    %c0_i32_0 = arith.constant 0 : i32
    %c0_i32_1 = arith.constant 0 : i32
    return %c0_i32, %c0_i32_0 : i32, i32
  }
  func.func @transform_5(%arg0: i32) -> (i32, i32, i32) {
    %c0_i32 = arith.constant 0 : i32
    %c0_i32_0 = arith.constant 0 : i32
    %c0_i32_1 = arith.constant 0 : i32
    return %arg0, %c0_i32, %c0_i32_0 : i32, i32, i32
  }
  func.func @transform_6(%arg0: i32) -> (i32, i32, i32) {
    %c0_i32 = arith.constant 0 : i32
    %c0_i32_0 = arith.constant 0 : i32
    %c0_i32_1 = arith.constant 0 : i32
    return %arg0, %c0_i32, %c0_i32_0 : i32, i32, i32
  }
}

</mosaic_0001>

<bundles_post_ra>
// kernel: tpu_custom_call.1
= control target key start
LH: loop header
LB: loop body
LE: loop exit
PB: predicated region body
PF: predicated region fallthrough
CT: control target
= control target key end

     0   :  { %12 = vsyncpa [#allocation3], 0  ;;  %s1543_s0 = inlined_call_operand.vmem [shape: f32[2,36,256], index: 0, kind: input, shape index: {}]   ;;  %s1544_s1 = inlined_call_operand.vmem [shape: f32[2,36,256], index: 1, kind: input, shape index: {}]   ;;  %s1545_s2 = inlined_call_operand.vmem [shape: f32[8,36], index: 2, kind: input, shape index: {}]   ;;  %s1546_s3 = inlined_call_operand.vmem [shape: f32[8,1], index: 3, kind: input, shape index: {}]   ;;  %s1547_s4 = inlined_call_operand.vmem [shape: f32[8,1], index: 4, kind: input, shape index: {}]   ;;  %s1548_s5 = inlined_call_operand.hbm [shape: f32[2,8,256], index: 5, kind: output, shape index: {0}]   ;;  %s1549_s6 = inlined_call_operand.hbm [shape: f32[2,8,256], index: 6, kind: output, shape index: {1}]  }
   0x1   :  { %14 = vsyncpa [#allocation3 + $0x1], 0 }
   0x2   :  { %15 = vsyncpa [#allocation5], 0 }
   0x3   :  { %17 = vsyncpa [#allocation5 + $0x1], 0  ;;  %s1161_s21 = smov 0   ;;  %s1163_s22 = smov 0  }
   0x4   :  { %s1165_s23 = smov 0   ;;  %s1167_s24 = smov 0  }
   0x5 LB: > { %s1182_s25 = sadd.s32 4294967295, %s1119_s24   ;;  %s925_s26 = sadd.s32 4294967294, %s1119_s24   ;;  %s1119_s24 = sphi %s1167_s24, %s1555_s24   ;;  %s1115_s23 = sphi %s1165_s23, %s1554_s23   ;;  %s1111_s22 = sphi %s1163_s22, %s1553_s22   ;;  %s1107_s21 = sphi %s1161_s21, %s1552_s21  }
   0x6   : > { %s1186_s27 = sadd.s32 1, %s1119_s24   ;;  %s145_s28 = sadd.s32 1, %s1115_s23 }
   0x7   : > { %s142_s29 = ssub.s32 %s1119_s24, %s1186_s27  ;;  %p155_p0 = scmp.ne.s32.totalorder %s1115_s23, %s1111_s22 }
   0x8   : > { %p143_p1 = scmp.eq.s32.totalorder %s142_s29, 0  ;;  %p156_p2 = scmp.eq.s32.totalorder %s1182_s25, 1 }
   0x9   : > { %p161_p3 = scmp.ne.s32.totalorder %s1111_s22, %s1107_s21  ;;  %p162_p4 = scmp.eq.s32.totalorder %s925_s26, 1 }
   0xa   : > { %s1197_s30 = scalar_select %p143_p1, %s1115_s23, %s145_s28  }
   0xb   : > { %p1199_p5 = por %p156_p2, %p155_p0  ;;  %p1203_p6 = por %p162_p4, %p161_p3 }
   0xc   : > { %p928_p7 = scmp.ge.s32.totalorder %s1119_s24, 1  ;;  %p231_p8 = scmp.lt.s32.totalorder %s1119_s24, 3 }
   0xe   : > { %p232_p9 = pnand %p928_p7, %p231_p8 }
   0xf   : > { %p271_p10 = scmp.lt.s32.totalorder (!%p232_p9), %s1182_s25, 1  ;;  %s1410_s29 = sand.u32 (!%p232_p9), 1, %s1111_s22  }
  0x10   : > { %235 = sbr.rel (%p232_p9) target bundleno = 332 (0x14c), region = 40  ;;  %s929_s9 = sshll.u32 (!%p232_p9), %s1410_s29, 4 }
  0x11   : > { %s950_s10 = sshll.u32 (!%p232_p9), %s1182_s25, 8  ;;  %s789_s16 = scalar_lea.sflag (!%p232_p9), [#allocation3], %s1410_s29 }
  0x12   : > { %s1432_s15 = scalar_lea.hbm (!%p232_p9), %s1548_s5, %s950_s10  ;;  %s1123_s18 = smov (!%p232_p9), [#allocation2]  }
  0x13   : > { %s1033_s19 = sshll.u32 (!%p232_p9), %s1123_s18, 4  ;;  %s1034_s19 = int_to_ptr.vmem [resolvable:$false] %s1033_s19 }
  0x15   : > { %v1121_v0 = vmov 0.0   ;;  %v282_v1 = vld [vmem:[%s1546_s3] sm:$0xff]  ;;  %s272_s11 = scalar_select %p271_p10, %s1182_s25, 1  ;;  %v1122_v2 = vmov 0   ;;  %vm408_vm0 = vcmask 1043456   ;;  %vm404_vm1 = vcmask 293888  }
  0x16   : > { %491 = vmatprep.mubr.f32.mxu0 %v1121_v0  ;;  %562 = vmatprep.mubr.f32.mxu1 %v1121_v0  ;;  %v283_v3 = vld [vmem:[%s1547_s4] sm:$0xff] }
  0x17   : > { %1000 = vset.pattern.permute.xlu0 %v1122_v2  ;;  %s952_s12 = smul.u32 80, %s272_s11  ;;  %v1269_v46 = vld [vmem:[%s1545_s2] sm:$0xff]  ;;  %s263_s11 = scalar_lea.vmem [#allocation2], %s929_s9 }
  0x18   : > { %662 = vperm.xlu0 %1000, %v282_v1  }
  0x19   : > { %s1222_s17 = scalar_lea.vmem %s1543_s0, %s952_s12  ;;  %s1227_s20 = scalar_lea.vmem %s1544_s1, %s952_s12 }
  0x1a   : > { %v293_v4 = vld [vmem:[%s1222_s17 + $0x48] sm:$0xf]  ;;  %v292_v6 = vld [vmem:[%s1222_s17 + $0x40] sm:$0xf]  ;;  %v291_v11 = vld [vmem:[%s1222_s17 + $0x38] sm:$0xff]  ;;  %s808_s12 = sshll.u32 %s263_s11, 4  ;;  %s1434_s12 = int_to_ptr.vmem [resolvable:$true] %s808_s12 }
  0x1b   : > { %v303_v5 = vld [vmem:[%s1227_s20 + $0x48] sm:$0xf]  ;;  %v313_v7 = vmul.f32 %v293_v4, %v293_v4  ;;  %933 = vmatprep.subr.msk.mxu0 %vm408_vm0, %v293_v4  ;;  %v312_v9 = vmul.f32 %v292_v6, %v292_v6  ;;  %v302_v10 = vld [vmem:[%s1227_s20 + $0x40] sm:$0xf]  ;;  %v301_v12 = vld [vmem:[%s1227_s20 + $0x38] sm:$0xff]  ;;  %v311_v14 = vmul.f32 %v291_v11, %v291_v11  ;;  %p1036_p0 = scmp.lt.s32.totalorder %s1434_s12, %s1034_s19 }
  0x1c   : > { %773 = vperm.xlu0 %1000, %v283_v3   ;;  %v323_v8 = vmul.f32 %v303_v5, %v303_v5  ;;  %936 = vmatprep.subr.msk.mxu1 %vm408_vm0, %v303_v5  ;;  %v322_v13 = vmul.f32 %v302_v10, %v302_v10  ;;  %v321_v15 = vmul.f32 %v301_v12, %v301_v12  ;;  %v290_v16 = vld [vmem:[%s1222_s17 + $0x30] sm:$0xff]  ;;  %v289_v18 = vld [vmem:[%s1222_s17 + $0x28] sm:$0xff]  ;;  %v288_v23 = vld [vmem:[%s1222_s17 + $0x20] sm:$0xff] }
  0x1d   : > { %934 = vmatpush1.msk.msra.mxu0 %vm408_vm0, %v292_v6  ;;  %937 = vmatpush1.msk.msra.mxu1 %vm408_vm0, %v302_v10  ;;  %v300_v17 = vld [vmem:[%s1227_s20 + $0x30] sm:$0xff]  ;;  %v310_v20 = vmul.f32 %v290_v16, %v290_v16  ;;  %v299_v22 = vld [vmem:[%s1227_s20 + $0x28] sm:$0xff]  ;;  %v298_v24 = vld [vmem:[%s1227_s20 + $0x20] sm:$0xff]  ;;  %v308_v31 = vmul.f32 %v288_v23, %v288_v23  ;;  %v309_v34 = vmul.f32 %v289_v18, %v289_v18 }
  0x1e   : > { %v1242_v19 = vadd.f32 %v323_v8, %v313_v7  ;;  %451 = vmatprep.subr.mxu0 %v291_v11  ;;  %522 = vmatprep.subr.mxu1 %v301_v12  ;;  %v320_v21 = vmul.f32 %v300_v17, %v300_v17  ;;  %v1247_v25 = vadd.f32 %v322_v13, %v312_v9  ;;  %v287_v26 = vld [vmem:[%s1222_s17 + $0x18] sm:$0xff]  ;;  %v286_v28 = vld [vmem:[%s1222_s17 + $0x10] sm:$0xff]  ;;  %v285_v33 = vld [vmem:[%s1222_s17 + $0x8] sm:$0xff] }
  0x1f   : > { %452 = vmatpush1.msra.mxu0 %v290_v16  ;;  %523 = vmatpush1.msra.mxu1 %v300_v17  ;;  %v297_v27 = vld [vmem:[%s1227_s20 + $0x18] sm:$0xff]  ;;  %v1253_v29 = vadd.f32 %v321_v15, %v311_v14  ;;  %v296_v32 = vld [vmem:[%s1227_s20 + $0x10] sm:$0xff]  ;;  %v319_v35 = vmul.f32 %v299_v22, %v299_v22  ;;  %v318_v36 = vmul.f32 %v298_v24, %v298_v24  ;;  %v295_v37 = vld [vmem:[%s1227_s20 + $0x8] sm:$0xff] }
  0x20   : > { %1001 = vrsqrt.f32 %v1242_v19  ;;  %v1255_v30 = vadd.f32 %v320_v21, %v310_v20  ;;  %453 = vmatprep.subr.mxu0 %v289_v18  ;;  %524 = vmatprep.subr.mxu1 %v299_v22  ;;  %v284_v38 = vld [vmem:[%s1222_s17] sm:$0xff]  ;;  %v307_v39 = vmul.f32 %v287_v26, %v287_v26  ;;  %v306_v40 = vmul.f32 %v286_v28, %v286_v28  ;;  %s1029_s17 = scalar_lea.vmem %s1434_s12, 256 }
  0x21   : > { %1003 = vrsqrt.f32 %v1247_v25  ;;  %454 = vmatpush1.msra.mxu0 %v288_v23  ;;  %525 = vmatpush1.msra.mxu1 %v298_v24  ;;  %v316_v41 = vmul.f32 %v296_v32, %v296_v32  ;;  %v294_v42 = vld [vmem:[%s1227_s20] sm:$0xff]  ;;  %v1264_v43 = vadd.f32 %v318_v36, %v308_v31  ;;  %v317_v44 = vmul.f32 %v297_v27, %v297_v27  ;;  %p1030_p11 = scmp.ne.s32.totalorder %s1434_s12, %s1029_s17  ;;  %s1035_s20 = scalar_lea.vmem %s1034_s19, 512 }
  0x22   : > { %1005 = vrsqrt.f32 %v1255_v30  ;;  %455 = vmatprep.subr.mxu0 %v287_v26  ;;  %526 = vmatprep.subr.mxu1 %v297_v27  ;;  %v305_v45 = vmul.f32 %v285_v33, %v285_v33  ;;  %v315_v48 = vmul.f32 %v295_v37, %v295_v37  ;;  %v304_v49 = vmul.f32 %v284_v38, %v284_v38  ;;  %p1037_p1 = scmp.lt.s32.totalorder %s1035_s20, %s1029_s17 }
  0x23   : > { %456 = vmatpush1.msra.mxu0 %v286_v28  ;;  %527 = vmatpush1.msra.mxu1 %v296_v32  ;;  %v1271_v47 = vadd.f32 %v316_v41, %v306_v40  ;;  %1007 = vrsqrt.f32 %v1264_v43  ;;  %v314_v50 = vmul.f32 %v294_v42, %v294_v42  ;;  %v1274_v51 = vadd.f32 %v319_v35, %v309_v34  ;;  %p1031_p12 = pnand %p1030_p11, %p1199_p5 }
  0x24   : > { %457 = vmatprep.subr.mxu0 %v285_v33  ;;  %528 = vmatprep.subr.mxu1 %v295_v37  ;;  %v1281_v52 = vadd.f32 %v317_v44, %v307_v39  ;;  %v1287_v54 = vadd.f32 %v315_v48, %v305_v45  ;;  %vm399_vm2 = vcmp.eq.f32.partialorder %v1242_v19, inf  ;;  %v402_v56 = vand.u32 2147483648, %v1242_v19  ;;  %p1038_p2 = por %p1037_p1, %p1036_p0 }
  0x25   : > { %458 = vmatpush1.msra.mxu0 %v284_v38  ;;  %529 = vmatpush1.msra.mxu1 %v294_v42  ;;  %1009 = vrsqrt.f32 %v1271_v47  ;;  %v1283_v53 = vadd.f32 %v314_v50, %v304_v49  ;;  %vm401_vm3 = vcmp.eq.f32.partialorder %v1242_v19, 0.0  ;;  %vm392_vm4 = vcmp.eq.f32.partialorder %v1247_v25, inf  ;;  %p1032_p13 = pneg %p1031_p12 }
  0x26   : > { %935 = vmatmul.mubr.msk.f32.vlgmr.msra.gmra.mxu0 %vm404_vm1, %v1269_v46  ;;  %938 = vmatmul.mubr.msk.f32.vlgmr.msra.gmra.mxu1 %vm404_vm1, %v1269_v46  ;;  %1011 = vrsqrt.f32 %v1253_v29  ;;  %v395_v59 = vand.u32 2147483648, %v1247_v25  ;;  %vm394_vm5 = vcmp.eq.f32.partialorder %v1247_v25, 0.0  ;;  %vm385_vm6 = vcmp.eq.f32.partialorder %v1253_v29, inf }
  0x27   : > { %633 = vmatprep.mubr.f32.mxu0 %v1121_v0  ;;  %1013 = vrsqrt.f32 %v1283_v53  ;;  %vm387_vm7 = vcmp.eq.f32.partialorder %v1253_v29, 0.0  ;;  %vm378_vm8 = vcmp.eq.f32.partialorder %v1255_v30, inf  ;;  %v388_v5 = vand.u32 2147483648, %v1253_v29  ;;  %p1039_p3 = pnand %p1038_p2, %p1032_p13 }
  0x28   : > { %1015 = vrsqrt.f32 %v1274_v51  ;;  %vm380_vm9 = vcmp.eq.f32.partialorder %v1255_v30, 0.0  ;;  %v381_v6 = vand.u32 2147483648, %v1255_v30  ;;  %vm371_vm10 = vcmp.eq.f32.partialorder %v1274_v51, inf }
  0x29   : > { %1017 = vrsqrt.f32 %v1281_v52  ;;  %vm373_vm11 = vcmp.eq.f32.partialorder %v1274_v51, 0.0  ;;  %v374_v8 = vand.u32 2147483648, %v1274_v51  ;;  %vm364_vm12 = vcmp.eq.f32.partialorder %v1264_v43, inf }
  0x2a   : > { %1019 = vrsqrt.f32 %v1287_v54  ;;  %vm366_vm13 = vcmp.eq.f32.partialorder %v1264_v43, 0.0  ;;  %v367_v12 = vand.u32 2147483648, %v1264_v43  ;;  %vm357_vm14 = vcmp.eq.f32.partialorder %v1281_v52, inf }
  0x2b   : > { %vm359_vm15 = vcmp.eq.f32.partialorder %v1281_v52, 0.0  ;;  %v360_v16 = vand.u32 2147483648, %v1281_v52  ;;  %v353_v17 = vand.u32 2147483648, %v1271_v47  ;;  %v339_v33 = vand.u32 2147483648, %v1283_v53 }
  0x2d   : > { %v1002_v55 = vpop.eup %1001 }
  0x2e   : > { %v1004_v57 = vpop.eup %1003  ;;  %v398_v58 = vmul.f32 %v1002_v55, %v1242_v19 }
  0x2f   : > { %v1006_v60 = vpop.eup %1005  ;;  %v391_v61 = vmul.f32 %v1004_v57, %v1247_v25 }
  0x30   : > { %v400_v62 = vsel %vm399_vm2, %v1242_v19, %v398_v58  ;;  %v377_v63 = vmul.f32 %v1006_v60, %v1255_v30  ;;  %v1008_v3 = vpop.eup %1007  ;;  %vm352_vm2 = vcmp.eq.f32.partialorder %v1271_v47, 0.0 }
  0x31   : > { %v403_v1 = vsel %vm401_vm3, %v402_v56, %v400_v62  ;;  %v393_v2 = vsel %vm392_vm4, %v1247_v25, %v391_v61  ;;  %v363_v9 = vmul.f32 %v1008_v3, %v1264_v43  ;;  %vm343_vm3 = vcmp.eq.f32.partialorder %v1287_v54, inf }
  0x32   : > { %939 = vmatprep.subr.msk.mxu0 %vm408_vm0, %v403_v1  ;;  %v396_v4 = vsel %vm394_vm5, %v395_v59, %v393_v2  ;;  %v1010_v7 = vpop.eup %1009  ;;  %v379_v11 = vsel %vm378_vm8, %v1255_v30, %v377_v63  ;;  %vm336_vm4 = vcmp.eq.f32.partialorder %v1283_v53, inf  ;;  %vm345_vm5 = vcmp.eq.f32.partialorder %v1287_v54, 0.0 }
  0x33   : > { %940 = vmatpush1.msk.msra.mxu0 %vm408_vm0, %v396_v4  ;;  %v1012_v10 = vpop.eup %1011  ;;  %v349_v14 = vmul.f32 %v1010_v7, %v1271_v47  ;;  %vm350_vm0 = vcmp.eq.f32.partialorder %v1271_v47, inf  ;;  %v382_v20 = vsel %vm380_vm9, %v381_v6, %v379_v11  ;;  %v365_v21 = vsel %vm364_vm12, %v1264_v43, %v363_v9 }
  0x34   : > { %v384_v13 = vmul.f32 %v1012_v10, %v1253_v29  ;;  %v1014_v15 = vpop.eup %1013  ;;  %v346_v30 = vand.u32 2147483648, %v1287_v54  ;;  %v368_v31 = vsel %vm366_vm13, %v367_v12, %v365_v21 }
  0x35   : > { %v1016_v18 = vpop.eup %1015  ;;  %v335_v22 = vmul.f32 %v1014_v15, %v1283_v53  ;;  %v351_v28 = vsel %vm350_vm0, %v1271_v47, %v349_v14 }
  0x36   : > { %v386_v19 = vsel %vm385_vm6, %v1253_v29, %v384_v13  ;;  %v1018_v23 = vpop.eup %1017  ;;  %v370_v25 = vmul.f32 %v1016_v18, %v1274_v51  ;;  %vm338_vm6 = vcmp.eq.f32.partialorder %v1283_v53, 0.0  ;;  %v354_v38 = vsel %vm352_vm2, %v353_v17, %v351_v28 }
  0x37   : > { %v389_v24 = vsel %vm387_vm7, %v388_v5, %v386_v19  ;;  %v1020_v26 = vpop.eup %1019  ;;  %v356_v27 = vmul.f32 %v1018_v23, %v1281_v52  ;;  %v337_v36 = vsel %vm336_vm4, %v1283_v53, %v335_v22 }
  0x38   : > { %593 = vmatprep.subr.mxu0 %v389_v24  ;;  %v372_v29 = vsel %vm371_vm10, %v1274_v51, %v370_v25  ;;  %v342_v32 = vmul.f32 %v1020_v26, %v1287_v54  ;;  %v340_v41 = vsel %vm338_vm6, %v339_v33, %v337_v36 }
  0x39   : > { %594 = vmatpush1.msra.mxu0 %v382_v20  ;;  %v375_v34 = vsel %vm373_vm11, %v374_v8, %v372_v29  ;;  %v358_v35 = vsel %vm357_vm14, %v1281_v52, %v356_v27 }
  0x3a   : > { %595 = vmatprep.subr.mxu0 %v375_v34  ;;  %v361_v37 = vsel %vm359_vm15, %v360_v16, %v358_v35  ;;  %v344_v39 = vsel %vm343_vm3, %v1287_v54, %v342_v32 }
  0x3b   : > { %596 = vmatpush1.msra.mxu0 %v368_v31  ;;  %v347_v40 = vsel %vm345_vm5, %v346_v30, %v344_v39 }
  0x3c   : > { %597 = vmatprep.subr.mxu0 %v361_v37 }
  0x3d   : > { %598 = vmatpush1.msra.mxu0 %v354_v38 }
  0x3e   : > { %599 = vmatprep.subr.mxu0 %v347_v40 }
  0x3f   : > { %600 = vmatpush1.msra.mxu0 %v340_v41 }
  0x40   : > { %941 = vmatmul.mubr.msk.f32.vlgmr.msra.gmra.mxu0 %vm404_vm1, %v1269_v46 }
  0x93   : > { %v663_v3 = vpop.permute.xlu0 %662 }
  0xe6   : > { %v1371_v42 = vpop.f32.mrf.mxu0  ;;  %v564_v43 = vpop.f32.mrf.mxu1 }
  0xe7   : > { %v640_v44 = vmul.f32 %v1371_v42, %v1371_v42  ;;  %v642_v45 = vmul.f32 %v564_v43, %v564_v43  ;;  %vm669_vm7 = vcmp.lt.f32.partialorder %v564_v43, 1e-08  ;;  %vm671_vm8 = vcmp.gt.f32.partialorder %v564_v43, -1e-08 }
  0xe8   : > { %v1375_v47 = vpop.f32.mrf.mxu0  ;;  %v566_v48 = vpop.f32.mrf.mxu1  ;;  %v1378_v49 = vand.u32 2147483647, %v1371_v42  ;;  %vm673_vm9 = vmand %vm669_vm7, %vm671_vm8 }
  0xe9   : > { %v641_v50 = vmul.f32 %v1375_v47, %v1375_v47  ;;  %v644_v46 = vadd.f32 %v642_v45, %v640_v44  ;;  %v1382_v51 = vsel %vm673_vm9, 1e-08, %v564_v43  ;;  %v643_v52 = vmul.f32 %v566_v48, %v566_v48 }
  0xea   : > { %v1385_v53 = vand.u32 2147483647, %v1382_v51  ;;  %vm670_vm1 = vcmp.lt.f32.partialorder %v566_v48, 1e-08  ;;  %vm672_vm10 = vcmp.gt.f32.partialorder %v566_v48, -1e-08 }
  0xeb   : > { %1021 = vrsqrt.f32 %v644_v46  ;;  %v645_v54 = vadd.f32 %v643_v52, %v641_v50  ;;  %vm674_vm11 = vmand %vm670_vm1, %vm672_vm10  ;;  %v1392_v57 = vand.u32 2147483647, %v1375_v47  ;;  %vm648_vm12 = vcmp.eq.f32.partialorder %v644_v46, inf }
  0xec   : > { %v680_v55 = vmax.f32 %v1378_v49, %v1385_v53  ;;  %v1389_v56 = vsel %vm674_vm11, 1e-08, %v566_v48  ;;  %v679_v63 = vmin.f32 %v1378_v49, %v1385_v53  ;;  %v651_v1 = vand.u32 2147483648, %v644_v46 }
  0xed   : > { %1023 = vrsqrt.f32 %v645_v54  ;;  %v1395_v58 = vand.u32 2147483647, %v1389_v56  ;;  %vm650_vm13 = vcmp.eq.f32.partialorder %v644_v46, 0.0  ;;  %vm655_vm14 = vcmp.eq.f32.partialorder %v645_v54, inf }
  0xee   : > { %1025 = vrcp.f32 %v680_v55  ;;  %v658_v8 = vand.u32 2147483648, %v645_v54  ;;  %vm657_vm15 = vcmp.eq.f32.partialorder %v645_v54, 0.0 }
  0xef   : > { %v727_v59 = vmax.f32 %v1392_v57, %v1395_v58  ;;  %v726_v11 = vmin.f32 %v1392_v57, %v1395_v58 }
  0xf1   : > { %1027 = vrcp.f32 %v727_v59 }
  0xf8   : > { %v1022_v60 = vpop.eup %1021 }
  0xf9   : > { %v647_v61 = vmul.f32 %v1022_v60, %v644_v46 }
  0xfa   : > { %v1024_v62 = vpop.eup %1023 }
  0xfb   : > { %v1026_v2 = vpop.eup %1025  ;;  %v649_v4 = vsel %vm648_vm12, %v644_v46, %v647_v61  ;;  %v654_v5 = vmul.f32 %v1024_v62, %v645_v54 }
  0xfc   : > { %v1401_v6 = vmul.f32 %v1026_v2, %v679_v63  ;;  %v652_v7 = vsel %vm650_vm13, %v651_v1, %v649_v4 }
  0xfd   : > { %v656_v9 = vsel %vm655_vm14, %v645_v54, %v654_v5  ;;  %v665_v12 = vadd.f32 %v663_v3, %v652_v7 }
  0xfe   : > { %v1405_v10 = vmul.f32 %v1401_v6, %v1401_v6  ;;  %v659_v13 = vsel %vm657_vm15, %v658_v8, %v656_v9  ;;  %v1028_v14 = vpop.eup %1027 }
  0xff   : > { %v666_v15 = vadd.f32 %v663_v3, %v659_v13  ;;  %v1412_v16 = vmul.f32 %v1028_v14, %v726_v11  ;;  %v778_v21 = vmul.f32 0.5, %v665_v12 }
 0x100   : > { %v684_v17 = vmul.f32 0.002785687, %v1405_v10  ;;  %v635_v18 = vpop.f32.mrf.mxu0 }
 0x101   : > { %v1418_v19 = vmul.f32 %v1412_v16, %v1412_v16  ;;  %v667_v20 = vadd.f32 %v663_v3, %v635_v18  ;;  %v779_v24 = vmul.f32 0.5, %v666_v15 }
 0x102   : > { %v685_v22 = vadd.f32 -0.015866, %v684_v17  ;;  %v637_v23 = vpop.f32.mrf.mxu0 }
 0x103   : > { %v780_v25 = vmul.f32 0.5, %v667_v20  ;;  %v668_v26 = vadd.f32 %v663_v3, %v637_v23  ;;  %v731_v28 = vmul.f32 0.002785687, %v1418_v19 }
 0x104   : > { %v686_v27 = vmul.f32 %v685_v22, %v1405_v10 }
 0x105   : > { %v782_v30 = vadd.f32 %v780_v25, %v778_v21  ;;  %v781_v29 = vmul.f32 0.5, %v668_v26  ;;  %v732_v32 = vadd.f32 -0.015866, %v731_v28 }
 0x106   : > { %v687_v31 = vadd.f32 0.04247222, %v686_v27 }
 0x107   : > { %784 = vst [vmem:[%s263_s11] sm:$0xff] %v782_v30  ;;  %v783_v33 = vadd.f32 %v781_v29, %v779_v24  ;;  %v733_v35 = vmul.f32 %v732_v32, %v1418_v19 }
 0x108   : > { %v688_v34 = vmul.f32 %v687_v31, %v1405_v10 }
 0x109   : > { %785 = vst [vmem:[%s263_s11 + $0x8] sm:$0xff] %v783_v33  ;;  %v734_v37 = vadd.f32 0.04247222, %v733_v35 }
 0x10a   : > { %v689_v36 = vadd.f32 -0.074975304, %v688_v34 }
 0x10b   : > { %1042 = shalt.err (!%p1039_p3)
}
 0x10c   : > { %s1043_s26 = scalar_lea.hbm %s1432_s15, 256  ;;  %s1047_s13 = scalar_lea.hbm %s1548_s5, 512 }
 0x10d   : > { %p1044_p4 = scmp.ne.s32.totalorder %s1432_s15, %s1043_s26  ;;  %p1048_p9 = scmp.lt.s32.totalorder %s1432_s15, %s1548_s5 }
 0x10e   : > { %p1049_p10 = scmp.lt.s32.totalorder %s1047_s13, %s1043_s26 }
 0x10f   : > { %p1045_p7 = pnand %p1044_p4, %p1199_p5 }
 0x110   : > { %p1050_p11 = por %p1049_p10, %p1048_p9 }
 0x111   : > { %p1046_p8 = pneg %p1045_p7 }
 0x113   : > { %p1051_p12 = pnand %p1050_p11, %p1046_p8 }
 0x115   : > { %1054 = shalt.err (!%p1051_p12)
}
 0x116   : > { %953 = dma.vmem_to_hbm [thread:$0]  (%p1199_p5), %s1434_s12, 256, %s1432_s15, %s789_s16   ;;  %v690_v38 = vmul.f32 %v689_v36, %v1405_v10  ;;  %v735_v39 = vmul.f32 %v734_v37, %v1418_v19  ;;  %vm707_vm0 = vcmp.lt.s32.totalorder %v1371_v42, 0  ;;  %vm701_vm2 = vcmp.gt.f32.partialorder %v1385_v53, %v1378_v49  ;;  %v774_v23 = vpop.permute.xlu0 %773 }
 0x117   : > { %vm711_vm3 = vcmp.ne.f32.partialorder %v1371_v42, %v1371_v42  ;;  %vm712_vm4 = vcmp.ne.f32.partialorder %v1382_v51, %v1382_v51  ;;  %vm704_vm5 = vcmp.lt.f32.partialorder %v1371_v42, 0.0  ;;  %vm717_vm6 = vcmp.eq.s32.totalorder %v1378_v49, inf  ;;  %s270_s12 = scalar_lea.vmem [#allocation4], %s929_s9  ;;  %s820_s19 = scalar_lea.hbm %s1549_s6, %s950_s10 }
 0x118   : > { %v691_v40 = vadd.f32 0.1064488, %v690_v38  ;;  %v736_v41 = vadd.f32 -0.074975304, %v735_v39  ;;  %vm718_vm7 = vcmp.eq.s32.totalorder %v1385_v53, inf  ;;  %vm709_vm8 = vcmp.eq.f32.partialorder %v1382_v51, 0.0  ;;  %vm713_vm11 = vmor %vm711_vm3, %vm712_vm4 }
 0x119   : > { %vm754_vm9 = vcmp.lt.s32.totalorder %v1375_v47, 0  ;;  %vm748_vm1 = vcmp.gt.f32.partialorder %v1395_v58, %v1392_v57  ;;  %vm758_vm10 = vcmp.ne.f32.partialorder %v1375_v47, %v1375_v47  ;;  %vm759_vm12 = vcmp.ne.f32.partialorder %v1389_v56, %v1389_v56  ;;  %vm719_vm13 = vmand %vm717_vm6, %vm718_vm7  ;;  %s822_s15 = sshll.u32 %s270_s12, 4  ;;  %s794_s20 = scalar_lea.sflag [#allocation5], %s1410_s29  ;;  %s823_s15 = int_to_ptr.vmem [resolvable:$true] %s822_s15 }
 0x11a   : > { %v692_v43 = vmul.f32 %v691_v40, %v1405_v10  ;;  %v737_v44 = vmul.f32 %v736_v41, %v1418_v19  ;;  %v1124_v53 = vmov 0.7853982   ;;  %v755_v17 = vsel %vm754_vm9, 3.1415927, %v1121_v0  ;;  %s1055_s26 = scalar_lea.vmem %s823_s15, 256  ;;  %s1125_s28 = smov [#allocation4]  }
 0x11b   : > { %v716_v15 = vsel %vm704_vm5, 2.3561945, %v1124_v53  ;;  %vm751_vm14 = vcmp.lt.f32.partialorder %v1375_v47, 0.0  ;;  %vm765_vm15 = vcmp.eq.s32.totalorder %v1395_v58, inf  ;;  %v722_v20 = vand.u32 2147483648, %v1382_v51  ;;  %p1056_p13 = scmp.ne.s32.totalorder %s823_s15, %s1055_s26  ;;  %s1059_s11 = sshll.u32 %s1125_s28, 4  ;;  %s1060_s11 = int_to_ptr.vmem [resolvable:$false] %s1059_s11 }
 0x11c   : > { %v693_v45 = vadd.f32 -0.14207031, %v692_v43  ;;  %v738_v48 = vadd.f32 0.1064488, %v737_v44  ;;  %vm764_vm3 = vcmp.eq.s32.totalorder %v1392_v57, inf  ;;  %v769_v25 = vand.u32 2147483648, %v1389_v56  ;;  %p1062_p2 = scmp.lt.s32.totalorder %s823_s15, %s1060_s11 }
 0x11d   : > { %v763_v58 = vsel %vm751_vm14, 2.3561945, %v1124_v53  ;;  %vm766_vm4 = vmand %vm764_vm3, %vm765_vm15  ;;  %p1057_p0 = pnand %p1056_p13, %p1199_p5  ;;  %s1061_s9 = scalar_lea.vmem %s1060_s11, 512 }
 0x11e   : > { %v694_v50 = vmul.f32 %v693_v45, %v1405_v10  ;;  %v739_v46 = vmul.f32 %v738_v48, %v1418_v19  ;;  %p1063_p3 = scmp.lt.s32.totalorder %s1061_s9, %s1055_s26 }
 0x11f   : > { %p1058_p1 = pneg %p1057_p0 }
 0x120   : > { %v695_v52 = vadd.f32 0.19993454, %v694_v50  ;;  %v740_v54 = vadd.f32 -0.14207031, %v739_v46  ;;  %p1064_p4 = por %p1063_p3, %p1062_p2 }
 0x122   : > { %v696_v55 = vmul.f32 %v695_v52, %v1405_v10  ;;  %v741_v59 = vmul.f32 %v740_v54, %v1418_v19  ;;  %p1065_p7 = pnand %p1064_p4, %p1058_p1 }
 0x124   : > { %v697_v60 = vadd.f32 -0.33333147, %v696_v55  ;;  %v742_v61 = vadd.f32 0.19993454, %v741_v59 }
 0x126   : > { %v698_v62 = vmul.f32 %v697_v60, %v1405_v10  ;;  %v743_v63 = vmul.f32 %v742_v61, %v1418_v19  ;;  %v708_v10 = vsel %vm707_vm0, 3.1415927, %v1121_v0  ;;  %vm756_vm0 = vcmp.eq.f32.partialorder %v1389_v56, 0.0 }
 0x128   : > { %v699_v1 = vmul.f32 %v698_v62, %v1401_v6  ;;  %v744_v2 = vadd.f32 -0.33333147, %v743_v63 }
 0x12a   : > { %v700_v3 = vadd.f32 %v699_v1, %v1401_v6  ;;  %v745_v4 = vmul.f32 %v744_v2, %v1418_v19 }
 0x12c   : > { %v702_v5 = vsub.f32 1.5707964, %v700_v3  ;;  %v746_v7 = vmul.f32 %v745_v4, %v1412_v16 }
 0x12e   : > { %v703_v8 = vsel %vm701_vm2, %v702_v5, %v700_v3  ;;  %v747_v9 = vadd.f32 %v746_v7, %v1412_v16  ;;  %vm760_vm2 = vmor %vm758_vm10, %vm759_vm12 }
 0x12f   : > { %v705_v11 = vsub.f32 3.1415927, %v703_v8 }
 0x130   : > { %v749_v6 = vsub.f32 1.5707964, %v747_v9 }
 0x131   : > { %v706_v12 = vsel %vm704_vm5, %v705_v11, %v703_v8 }
 0x132   : > { %v710_v13 = vsel %vm709_vm8, %v708_v10, %v706_v12  ;;  %v750_v14 = vsel %vm748_vm1, %v749_v6, %v747_v9 }
 0x133   : > { %v714_v42 = vsel %vm713_vm11, nan, %v710_v13  ;;  %v752_v16 = vsub.f32 3.1415927, %v750_v14 }
 0x134   : > { %v720_v18 = vsel %vm719_vm13, %v716_v15, %v714_v42 }
 0x135   : > { %v721_v19 = vand.u32 2147483647, %v720_v18  ;;  %v753_v21 = vsel %vm751_vm14, %v752_v16, %v750_v14 }
 0x136   : > { %v757_v22 = vsel %vm756_vm0, %v755_v17, %v753_v21 }
 0x137   : > { %v723_v0 = vor.u32 %v722_v20, %v721_v19  ;;  %v761_v49 = vsel %vm760_vm2, nan, %v757_v22 }
 0x138   : > { %v767_v51 = vsel %vm766_vm4, %v763_v58, %v761_v49 }
 0x139   : > { %v768_v24 = vand.u32 2147483647, %v767_v51  ;;  %v776_v26 = vadd.f32 %v774_v23, %v723_v0 }
 0x13b   : > { %v770_v47 = vor.u32 %v769_v25, %v768_v24  ;;  %786 = vst [vmem:[%s270_s12] sm:$0xff] %v776_v26 }
 0x13d   : > { %v777_v27 = vadd.f32 %v774_v23, %v770_v47 }
 0x13f   : > { %787 = vst [vmem:[%s270_s12 + $0x8] sm:$0xff] %v777_v27 }
 0x140   : > { %1068 = shalt.err (!%p1065_p7)
}
 0x141   : > { %s1069_s25 = scalar_lea.hbm %s820_s19, 256  ;;  %s1073_s13 = scalar_lea.hbm %s1549_s6, 512 }
 0x142   : > { %p1070_p8 = scmp.ne.s32.totalorder %s820_s19, %s1069_s25  ;;  %p1074_p11 = scmp.lt.s32.totalorder %s820_s19, %s1549_s6 }
 0x143   : > { %p1075_p12 = scmp.lt.s32.totalorder %s1073_s13, %s1069_s25 }
 0x144   : > { %p1071_p9 = pnand %p1070_p8, %p1199_p5 }
 0x145   : > { %p1076_p13 = por %p1075_p12, %p1074_p11 }
 0x146   : > { %p1072_p10 = pneg %p1071_p9 }
 0x148   : > { %p1077_p0 = pnand %p1076_p13, %p1072_p10 }
 0x14a   : > { %1080 = shalt.err (!%p1077_p0)
}
 0x14b   : > { %954 = dma.vmem_to_hbm [thread:$0]  (%p1199_p5), %s823_s15, 256, %s820_s19, %s794_s20  }
 0x14c PF: > { %p964_p1 = scmp.ge.s32.totalorder %s1119_s24, 2  ;;  %s834_s12 = sand.u32 1, %s1107_s21  }
 0x14d   : > { %s835_s16 = scalar_lea.sflag [#allocation3], %s834_s12 }
 0x14e   : > { %p958_p2 = pnand %p964_p1, %p1203_p6 }
 0x150   : > { %p959_p3 = pneg %p958_p2 }
 0x152   : > { %1098 = dma.done.wait (%p959_p3), %s835_s16, 256  }
 0x153   : > { %1100 = vsyncadd (%p959_p3), %s835_s16, 4294967040  ;;  %s844_s17 = scalar_lea.sflag [#allocation5], %s834_s12 }
 0x154   : > { %1102 = dma.done.wait (%p959_p3), %s844_s17, 256  }
 0x155   : > { %1104 = vsyncadd (%p959_p3), %s844_s17, 4294967040  ;;  %p20_p5 = scmp.ge.s32.totalorder %s1186_s27, 4   ;;  %s1552_s21 = smov %s1111_s22 }
 0x156   : > { %s1553_s22 = smov %s1115_s23  ;;  %s1554_s23 = smov %s1197_s30 }
 0x157   : > { %s1555_s24 = smov %s1186_s27  ;;  %22 = sbr.rel (!%p20_p5) target bundleno = 5 (0x5), region = 95 }
 0x15c   :  { %849 = vsyncpa [#allocation3], 1 }
 0x15d   :  { %851 = vsyncpa [#allocation3 + $0x1], 1 }
 0x15e   :  { %852 = vsyncpa [#allocation5], 1 }
 0x15f   :  { %854 = vsyncpa [#allocation5 + $0x1], 1 }

</bundles_post_ra>
